<compile_context>
chip_gen: v7x
topology: tpu7x:2x2x1
jax: 0.10.0
libtpu: 0.0.40
codegen_flags: <defaults>
</compile_context>

<pallas_src>
import functools

import jax
import jax.numpy as jnp
from jax import lax
from jax.experimental import pallas as pl
from jax.experimental.pallas import tpu as pltpu

SQRT_EPSILON = 1e-7
EXP_POWER = 2          # hist = exp(-(d + eps)^EXP_POWER / T)
# Padded pixels/bins get this value: the circular distance becomes ~1e9, so
# exp(-(1e9)^2 / T) underflows to exactly 0 (in f32 and bf16) and padding
# contributes nothing -- no in-kernel validity mask needed.
_SENTINEL = 1e9


def _round_up(x, m):
    return (x + m - 1) // m * m


def _soft_hist_kernel(x_ref, bins_ref, out_ref, *, vmax, neg_inv_temp,
                      strips, simple_circular, compute_dtype):
    """One (image, shard, step) tile of the soft-histogram accumulation.

    x_ref:    (strips, 128)  gray pixels, lane-dense (pixels on the lane axis)
    bins_ref: (Bp, 128)      bin centers replicated across the 128 lanes
    out_ref:  (Bp, 128)      per-(image, shard) lane-partial sums; stays
                             resident across the inner ("arbitrary") grid axis.
    """
    i = pl.program_id(2)

    @pl.when(i == 0)
    def _():
        out_ref[...] = jnp.zeros_like(out_ref)

    vmax_c = jnp.asarray(vmax, compute_dtype)
    scale = jnp.asarray(neg_inv_temp, compute_dtype)
    eps = jnp.asarray(SQRT_EPSILON, compute_dtype)

    def body(s, acc):
        # One 128-pixel strip against all bins.  xs is (1, 128) -> cheap
        # sublane broadcast against the (Bp, 128) bin tile (pure VPU).
        xs = x_ref[pl.ds(s, 1), :]
        c = bins_ref[...]                              # loaded per strip: keeps
        diff = xs - c                                  # vreg live ranges tight
        a = jnp.abs(diff)
        if simple_circular:
            # == min(|diff|, |diff-vmax|, |diff+vmax|) for values in [0, vmax]
            d = jnp.minimum(a, vmax_c - a)
        else:
            d = jnp.minimum(a, jnp.abs(diff - vmax_c))
            d = jnp.minimum(d, jnp.abs(diff + vmax_c))
        t = d + eps
        w = jnp.exp(t * t * scale)                     # exp on the EUP
        return acc + w.astype(jnp.float32)             # VPU accumulate, f32

    acc0 = jnp.zeros(out_ref.shape, jnp.float32)
    acc = lax.fori_loop(0, strips, body, acc0)
    out_ref[...] += acc


def soft_histogram_sums(images_mchw, bin_centers, vmax, temperature, *,
                        tile_pixels=16384, pixel_shards=1,
                        compute_dtype=jnp.float32, simple_circular=True):
    """Per-image per-bin sums of exp(-(circ_dist+eps)^2/T) over gray pixels.

    images_mchw: (M, C, H, W).  Returns ((M, bins) sums, num_pixels_per_image).
    """
    M, C, H, W = images_mchw.shape
    N = H * W

    # Gray-scale channel mean in the wrapper (torch: cur_image.mean(0)).
    x = jnp.mean(images_mchw.astype(jnp.float32), axis=1).reshape(M, N)

    B = int(bin_centers.shape[0])
    Bp = _round_up(B, 8)            # bins live on sublanes -> multiple of 8
    csize = jnp.dtype(compute_dtype).itemsize

    # VMEM cap from hardware (v7x has 64 MiB/TC vs 128 MiB on v5e/v6e).
    vmem_cap = 32 << 20
    try:
        vmem_cap = max(8 << 20,
                       min(vmem_cap, pltpu.get_tpu_info().vmem_capacity_bytes // 4))
    except Exception:
        pass

    # Real per-step allocations: double-buffered pixel tile + bins + resident
    # output accumulator + headroom for per-strip (Bp,128) temporaries/spills.
    fixed_bytes = 2 * Bp * 128 * csize + 2 * Bp * 128 * 4 + 8 * Bp * 128 * 4
    max_tn = max(1024, ((vmem_cap // 2 - fixed_bytes) // (2 * csize)) // 1024 * 1024)

    # tn must be a multiple of 1024 so the (tn//128, 128) block is (8,128)-tiled.
    tn = max(1024, min(int(tile_pixels), _round_up(N, 1024), max_tn))
    tn = _round_up(tn, 1024)

    tiles_needed = -(-N // tn)
    shards = max(1, min(int(pixel_shards), tiles_needed))
    steps = -(-tiles_needed // shards)
    total_tiles = shards * steps
    Np = total_tiles * tn

    # Sentinel-pad instead of masking inside the kernel.
    if Np != N:
        x = jnp.pad(x, ((0, 0), (0, Np - N)), constant_values=_SENTINEL)
    # Lane-dense pixel tiles: (tile, strip, 128) -- contiguous rows, dense DMA.
    x = x.reshape(M * total_tiles, tn // 128, 128).astype(compute_dtype)

    bins_pad = jnp.pad(bin_centers.astype(jnp.float32), (0, Bp - B),
                       constant_values=_SENTINEL)
    bins2d = jnp.broadcast_to(bins_pad[:, None], (Bp, 128)).astype(compute_dtype)

    kern = functools.partial(_soft_hist_kernel, vmax=float(vmax),
                             neg_inv_temp=-1.0 / float(temperature),
                             strips=tn // 128,
                             simple_circular=bool(simple_circular),
                             compute_dtype=compute_dtype)

    vmem_limit = int(min(vmem_cap,
                         max(16 << 20, 2 * (2 * tn * csize + fixed_bytes))))

    out = pl.pallas_call(
        kern,
        out_shape=jax.ShapeDtypeStruct((M * shards, Bp, 128), jnp.float32),
        grid_spec=pltpu.PrefetchScalarGridSpec(
            num_scalar_prefetch=0,
            grid=(M, shards, steps),
            in_specs=[
                pl.BlockSpec(
                    (None, tn // 128, 128),
                    lambda m, p, i: (m * total_tiles + p * steps + i, 0, 0)),
                pl.BlockSpec((Bp, 128), lambda m, p, i: (0, 0)),
            ],
            out_specs=pl.BlockSpec(
                (None, Bp, 128), lambda m, p, i: (m * shards + p, 0, 0)),
        ),
        # On v7x, verify the 'parallel' axes actually split across the two
        # TensorCores; if not, switch the shard/M axis to pltpu.CORE_PARALLEL.
        compiler_params=pltpu.CompilerParams(
            dimension_semantics=("parallel", "parallel", "arbitrary"),
            vmem_limit_bytes=vmem_limit),
    )(x, bins2d)

    # Tiny epilogue in plain JAX: lane reduce, drop padded bins, merge shards.
    sums = out.sum(axis=-1).reshape(M, shards, Bp)[:, :, :B].sum(axis=1)  # (M, B)
    return sums, N


def compute_soft_histograms(images_mchw, bin_centers, vmax, temperature, **kw):
    """Mirrors ComputeSoftHistogram (gray, patch_size=1, no mask, KDE=False).

    Returns an (M, bins) batch of probability vectors (each sums to 1).
    """
    sums, n_pix = soft_histogram_sums(images_mchw, bin_centers, vmax,
                                      temperature, **kw)
    hist = sums / n_pix                              # torch: exp(hist).mean(0)
    normalizer = jnp.sum(hist, axis=1, keepdims=True) / n_pix
    hist = hist / normalizer / n_pix                 # torch: hist/normalizer/N
    return hist.astype(jnp.float32)


class SoftHistogramLossPallas:
    """gray_scale=True, patch_size=1, automatic_temperature=False,
    dictionary_not_histogram=False, masks=None."""

    def __init__(self, bins, vmin, vmax, desired_hist_images, temperature=0.05,
                 compute_dtype=jnp.float32):
        # compute_dtype=jnp.bfloat16 gives ~2x on the VALU-bound hot loop on
        # v6e/v7x (f32 accumulator preserved); keep f32 on v5e and when
        # validating against the (f64) reference semantics.
        self.vmax = float(vmax)
        self.temperature = float(temperature)
        self.compute_dtype = compute_dtype
        # The trimmed circular distance is exact only for values in [0, vmax].
        self.simple_circular = (float(vmin) >= 0.0) and (float(vmax) > 0.0)
        # deterministic "parameters": bin centers (torch.linspace(min, max, bins))
        self.bin_centers = jnp.linspace(float(vmin), float(vmax), bins,
                                        dtype=jnp.float32)
        # torch __init__ uses only the first desired image (detached hist)
        desired = jnp.stack([desired_hist_images[0]], axis=0)       # (1,C,H,W)
        self.desired_hist = compute_soft_histograms(
            desired, self.bin_centers, self.vmax, self.temperature,
            compute_dtype=self.compute_dtype,
            simple_circular=self.simple_circular)[0]                # [bins]

    def forward(self, cur_images):
        # Batch all images into one pallas_call (batch grid axis) instead of a
        # per-image Python loop of launches.
        imgs = jnp.stack(list(cur_images), axis=0)                  # (M,C,H,W)
        hists = compute_soft_histograms(
            imgs, self.bin_centers, self.vmax, self.temperature,
            compute_dtype=self.compute_dtype,
            simple_circular=self.simple_circular)                   # (M,bins)
        eps = jnp.finfo(jnp.float32).eps
        log_q = jnp.log(hists + eps)                  # return_log_hist=True
        p = jnp.broadcast_to(self.desired_hist[None, :], log_q.shape)
        # torch.nn.KLDivLoss() default reduction='mean':
        #   mean over all elements of target * (log(target) - input)
        loss = jnp.mean(p * (jnp.log(p) - log_q))
        return loss.astype(jnp.float32)


def _reference_loss(cur_images, desired_image, bin_centers, vmax, temperature):
    """Pure-JAX reference of the same forward (for sanity check)."""
    def hist_of(img):
        x = jnp.mean(img.astype(jnp.float32), axis=0).reshape(-1)   # [N]
        diff = x[:, None] - bin_centers[None, :]
        d = jnp.abs(diff)
        d = jnp.minimum(d, jnp.abs(diff - vmax))
        d = jnp.minimum(d, jnp.abs(diff + vmax))
        w = jnp.exp(-((d + SQRT_EPSILON) ** EXP_POWER) / temperature)
        h = jnp.mean(w, axis=0)
        normalizer = jnp.sum(h) / x.shape[0]
        return h / normalizer / x.shape[0]

    p = hist_of(desired_image)
    eps = jnp.finfo(jnp.float32).eps
    terms = [jnp.mean(p * (jnp.log(p) - jnp.log(hist_of(ci) + eps)))
             for ci in cur_images]
    return jnp.mean(jnp.stack(terms))


if __name__ == "__main__":
    key = jax.random.PRNGKey(0)
    k1, k2, k3 = jax.random.split(key, 3)
    # small shapes: M=2 current images, C=3, H=W=16 -> N = 256 pixels, bins = 128
    cur_images = [jax.random.uniform(k1, (3, 16, 16), dtype=jnp.float32),
                  jax.random.uniform(k3, (3, 16, 16), dtype=jnp.float32)]
    desired_image = jax.random.uniform(k2, (3, 16, 16), dtype=jnp.float32)

    bins, vmin, vmax, temperature = 128, 0.0, 1.0, 0.05

    loss_mod = SoftHistogramLossPallas(bins, vmin, vmax, [desired_image],
                                       temperature=temperature)
    loss = jax.block_until_ready(loss_mod.forward(cur_images))

    ref = jax.block_until_ready(
        _reference_loss(cur_images, desired_image, loss_mod.bin_centers,
                        vmax, temperature))
    # f32 kernel vs f32 reference: only summation-order / distance-algebra
    # rounding differences remain.
    assert jnp.allclose(loss, ref, rtol=1e-3, atol=1e-5), (loss, ref)

    print("KERNEL_OK")
</pallas_src>

<mosaic_0001>
module attributes {stable_mosaic.version = 11 : i64} {
  func.func @_soft_hist_kernel(%arg0: i32, %arg1: i32, %arg2: i32, %arg3: memref<1x8x128xf32, #tpu.memory_space<vmem>>, %arg4: memref<128x128xf32, #tpu.memory_space<vmem>>, %arg5: memref<1x128x128xf32, #tpu.memory_space<vmem>>) attributes {dimension_semantics = [#tpu.dimension_semantics<parallel>, #tpu.dimension_semantics<parallel>, #tpu.dimension_semantics<arbitrary>], iteration_bounds = array<i64: 1, 1, 1>, scalar_prefetch = 0 : i64, scratch_operands = 0 : i64, tpu.core_type = #tpu.core_type<tc>, window_params = [{transform_indices = @transform_0, window_bounds = array<i64: 1, 8, 128>}, {pipeline_mode = #tpu.pipeline_mode<synchronous>, transform_indices = @transform_1, window_bounds = array<i64: 128, 128>}, {transform_indices = @transform_2, window_bounds = array<i64: 1, 128, 128>}]} {
    %c0_i32 = arith.constant 0 : i32
    %0 = arith.cmpi eq, %arg2, %c0_i32 : i32
    %1 = arith.extui %0 : i1 to i32
    %c0_i32_0 = arith.constant 0 : i32
    %2 = arith.cmpi ne, %1, %c0_i32_0 : i32
    scf.if %2 {
      %cst_11 = arith.constant 0.000000e+00 : f32
      %12 = vector.broadcast %cst_11 : f32 to vector<128x128xf32>
      %c0_12 = arith.constant 0 : index
      %c0_13 = arith.constant 0 : index
      %c0_14 = arith.constant 0 : index
      %13 = vector.load %arg5[%c0_12, %c0_13, %c0_14] : memref<1x128x128xf32, #tpu.memory_space<vmem>>, vector<1x128x128xf32>
      %14 = vector.shape_cast %13 : vector<1x128x128xf32> to vector<128x128xf32>
      %15 = vector.shape_cast %12 : vector<128x128xf32> to vector<1x128x128xf32>
      tpu.vector_store %arg5[%c0_12, %c0_13, %c0_14], %15 {strides = array<i32>} : memref<1x128x128xf32, #tpu.memory_space<vmem>>, vector<1x128x128xf32>,
    } else {
    }
    %cst = arith.constant 0.000000e+00 : f32
    %3 = vector.broadcast %cst : f32 to vector<128x128xf32>
    %cst_1 = arith.constant 1.000000e+00 : f32
    %cst_2 = arith.constant 1.000000e-07 : f32
    %cst_3 = arith.constant -2.000000e+01 : f32
    %c0_i32_4 = arith.constant 0 : i32
    %c8_i32 = arith.constant 8 : i32
    %4 = arith.addi %c0_i32_4, %c8_i32 : i32
    %c1_i32 = arith.constant 1 : i32
    %5 = scf.for %arg6 = %c0_i32_4 to %4 step %c1_i32 iter_args(%arg7 = %3) -> (vector<128x128xf32>)  : i32 {
      %c0_11 = arith.constant 0 : index
      %12 = arith.index_cast %arg6 : i32 to index
      %c0_12 = arith.constant 0 : index
      %13 = vector.load %arg3[%c0_11, %12, %c0_12] : memref<1x8x128xf32, #tpu.memory_space<vmem>>, vector<1x1x128xf32>
      %14 = vector.shape_cast %13 : vector<1x1x128xf32> to vector<1x128xf32>
      %c0_13 = arith.constant 0 : index
      %c0_14 = arith.constant 0 : index
      %15 = vector.load %arg4[%c0_13, %c0_14] : memref<128x128xf32, #tpu.memory_space<vmem>>, vector<128x128xf32>
      %16 = vector.broadcast %14 : vector<1x128xf32> to vector<128x128xf32>
      %17 = arith.subf %16, %15 : vector<128x128xf32>
      %18 = math.absf %17 : vector<128x128xf32>
      %19 = vector.broadcast %cst_1 : f32 to vector<128x128xf32>
      %20 = arith.subf %19, %18 : vector<128x128xf32>
      %21 = arith.minimumf %18, %20 : vector<128x128xf32>
      %22 = vector.broadcast %cst_2 : f32 to vector<128x128xf32>
      %23 = arith.addf %21, %22 : vector<128x128xf32>
      %24 = arith.mulf %23, %23 : vector<128x128xf32>
      %25 = vector.broadcast %cst_3 : f32 to vector<128x128xf32>
      %26 = arith.mulf %24, %25 : vector<128x128xf32>
      %27 = math.exp %26 : vector<128x128xf32>
      %28 = arith.addf %arg7, %27 : vector<128x128xf32>
      scf.yield %28 : vector<128x128xf32>
    }
    %c8_i32_5 = arith.constant 8 : i32
    %c0 = arith.constant 0 : index
    %c0_6 = arith.constant 0 : index
    %c0_7 = arith.constant 0 : index
    %6 = vector.load %arg5[%c0, %c0_6, %c0_7] : memref<1x128x128xf32, #tpu.memory_space<vmem>>, vector<1x128x128xf32>
    %7 = vector.shape_cast %6 : vector<1x128x128xf32> to vector<128x128xf32>
    %8 = arith.addf %7, %5 : vector<128x128xf32>
    %c0_8 = arith.constant 0 : index
    %c0_9 = arith.constant 0 : index
    %c0_10 = arith.constant 0 : index
    %9 = vector.load %arg5[%c0_8, %c0_9, %c0_10] : memref<1x128x128xf32, #tpu.memory_space<vmem>>, vector<1x128x128xf32>
    %10 = vector.shape_cast %9 : vector<1x128x128xf32> to vector<128x128xf32>
    %11 = vector.shape_cast %8 : vector<128x128xf32> to vector<1x128x128xf32>
    tpu.vector_store %arg5[%c0_8, %c0_9, %c0_10], %11 {strides = array<i32>} : memref<1x128x128xf32, #tpu.memory_space<vmem>>, vector<1x128x128xf32>,
    return
  }
  func.func @transform_0(%arg0: i32, %arg1: i32, %arg2: i32) -> (i32, i32, i32) {
    %c1_i32 = arith.constant 1 : i32
    %0 = arith.muli %arg0, %c1_i32 : i32
    %c1_i32_0 = arith.constant 1 : i32
    %1 = arith.muli %arg1, %c1_i32_0 : i32
    %2 = arith.addi %0, %1 : i32
    %3 = arith.addi %2, %arg2 : i32
    %c0_i32 = arith.constant 0 : i32
    %c0_i32_1 = arith.constant 0 : i32
    %c0_i32_2 = arith.constant 0 : i32
    return %3, %c0_i32, %c0_i32_1 : i32, i32, i32
  }
  func.func @transform_1(%arg0: i32, %arg1: i32, %arg2: i32) -> (i32, i32) {
    %c0_i32 = arith.constant 0 : i32
    %c0_i32_0 = arith.constant 0 : i32
    %c0_i32_1 = arith.constant 0 : i32
    return %c0_i32, %c0_i32_0 : i32, i32
  }
  func.func @transform_2(%arg0: i32, %arg1: i32, %arg2: i32) -> (i32, i32, i32) {
    %c1_i32 = arith.constant 1 : i32
    %0 = arith.muli %arg0, %c1_i32 : i32
    %1 = arith.addi %0, %arg1 : i32
    %c0_i32 = arith.constant 0 : i32
    %c0_i32_0 = arith.constant 0 : i32
    %c0_i32_1 = arith.constant 0 : i32
    return %1, %c0_i32, %c0_i32_0 : i32, i32, i32
  }
}

</mosaic_0001>

<bundles_post_ra>
// kernel: tpu_custom_call.1
= control target key start
LH: loop header
LB: loop body
LE: loop exit
PB: predicated region body
PF: predicated region fallthrough
CT: control target
= control target key end

     0   :  { %7 = vsyncpa [#allocation3], 0  ;;  %s1001_s0 = inlined_call_operand.hbm [shape: f32[1,8,128], index: 0, kind: input, shape index: {}]   ;;  %s1002_s1 = inlined_call_operand.hbm [shape: f32[128,128], index: 1, kind: input, shape index: {}]   ;;  %s1003_s2 = inlined_call_operand.hbm [shape: f32[1,128,128], index: 2, kind: output, shape index: {}]  }
   0x1   :  { %8 = vsyncpa [#allocation6], 0 }
   0x2   :  { %9 = vsyncpa [#allocation4], 0  ;;  %s776_s9 = smov [#allocation2]   ;;  %s777_s11 = smov [#allocation5]  }
   0x3   :  { %s20_s10 = sshll.u32 %s776_s9, 4  ;;  %s29_s12 = sshll.u32 %s777_s11, 4  ;;  %s21_s10 = int_to_ptr.vmem [resolvable:$true] %s20_s10  ;;  %s797_s12 = int_to_ptr.vmem [resolvable:$true] %s29_s12 }
   0x4   :  { %s568_s15 = scalar_lea.hbm %s1001_s0, 128 }
   0x5   :  { %p569_p0 = scmp.ne.s32.totalorder %s1001_s0, %s568_s15  ;;  %p572_p1 = scmp.lt.u32.totalorder %s568_s15, %s1001_s0 }
   0x7   :  { %p574_p2 = pnand %p572_p1, %p569_p0 }
   0x9   :  { %577 = shalt.err (!%p574_p2)
}
   0xa   :  { %s578_s20 = scalar_lea.vmem %s21_s10, 128  ;;  %p583_p4 = scmp.lt.s32.totalorder %s21_s10, %s21_s10 }
   0xb   :  { %p579_p3 = scmp.ne.s32.totalorder %s21_s10, %s578_s20  ;;  %p584_p5 = scmp.lt.s32.totalorder %s578_s20, %s578_s20 }
   0xd   :  { %p585_p6 = por %p584_p5, %p583_p4 }
   0xf   :  { %p586_p7 = pnand %p585_p6, %p579_p3 }
  0x11   :  { %589 = shalt.err (!%p586_p7)
}
  0x12   :  { %23 = dma.hbm_to_vmem [thread:$0]  %s1001_s0, 128, %s21_s10, [#allocation3]  }
  0x13   :  { %s590_s25 = scalar_lea.hbm %s1002_s1, 2048 }
  0x14   :  { %p591_p8 = scmp.ne.s32.totalorder %s1002_s1, %s590_s25  ;;  %p594_p9 = scmp.lt.u32.totalorder %s590_s25, %s1002_s1 }
  0x16   :  { %p596_p10 = pnand %p594_p9, %p591_p8 }
  0x18   :  { %599 = shalt.err (!%p596_p10)
}
  0x19   :  { %s600_s30 = scalar_lea.vmem %s797_s12, 2048  ;;  %p605_p12 = scmp.lt.s32.totalorder %s797_s12, %s797_s12 }
  0x1a   :  { %p601_p11 = scmp.ne.s32.totalorder %s797_s12, %s600_s30  ;;  %p606_p13 = scmp.lt.s32.totalorder %s600_s30, %s600_s30 }
  0x1c   :  { %p607_p0 = por %p606_p13, %p605_p12 }
  0x1e   :  { %p608_p1 = pnand %p607_p0, %p601_p11 }
  0x20   :  { %611 = shalt.err (!%p608_p1)
}
  0x21   :  { %s778_s0 = smov 128   ;;  %s779_s3 = smov 8  }
  0x22   :  { %35 = dma.hbm_to_vmem [thread:$0]  %s1002_s1, 2048, %s797_s12, [#allocation6], %s778_s0, %s778_s0, %s779_s3  }
  0x23   :  { %702 = dma.done.wait [#allocation3], 128  }
  0x24   :  { %703 = vsyncadd [#allocation3], 4294967168 }
  0x25   :  { %704 = dma.done.wait [#allocation6], 2048  }
  0x26   :  { %705 = vsyncadd [#allocation6], 4294965248  ;;  %v780_v0 = vmov 0.0   ;;  %v831_v1 = vmov 0.0   ;;  %v833_v2 = vmov 0.0   ;;  %v835_v3 = vmov 0.0  }
  0x27   :  { %49 = vst [vmem:[#allocation7] sm:$0xff] %v780_v0  ;;  %50 = vst [vmem:[#allocation7 + $0x8] sm:$0xff] %v780_v0  ;;  %v837_v4 = vmov 0.0   ;;  %v839_v5 = vmov 0.0   ;;  %v841_v6 = vmov 0.0   ;;  %v843_v7 = vmov 0.0  }
  0x28   :  { %51 = vst [vmem:[#allocation7 + $0x10] sm:$0xff] %v780_v0  ;;  %52 = vst [vmem:[#allocation7 + $0x18] sm:$0xff] %v780_v0  ;;  %v845_v8 = vmov 0.0   ;;  %v847_v9 = vmov 0.0   ;;  %v849_v10 = vmov 0.0   ;;  %v851_v11 = vmov 0.0  }
  0x29   :  { %53 = vst [vmem:[#allocation7 + $0x20] sm:$0xff] %v780_v0  ;;  %54 = vst [vmem:[#allocation7 + $0x28] sm:$0xff] %v780_v0  ;;  %v853_v12 = vmov 0.0   ;;  %v855_v13 = vmov 0.0   ;;  %v857_v14 = vmov 0.0   ;;  %v859_v15 = vmov 0.0  }
  0x2a   :  { %55 = vst [vmem:[#allocation7 + $0x30] sm:$0xff] %v780_v0  ;;  %56 = vst [vmem:[#allocation7 + $0x38] sm:$0xff] %v780_v0  ;;  %v861_v16 = vmov 0.0   ;;  %s863_s1 = smov 0  }
  0x2b   :  { %57 = vst [vmem:[#allocation7 + $0x40] sm:$0xff] %v780_v0  ;;  %58 = vst [vmem:[#allocation7 + $0x48] sm:$0xff] %v780_v0 }
  0x2c   :  { %59 = vst [vmem:[#allocation7 + $0x50] sm:$0xff] %v780_v0  ;;  %60 = vst [vmem:[#allocation7 + $0x58] sm:$0xff] %v780_v0 }
  0x2d   :  { %61 = vst [vmem:[#allocation7 + $0x60] sm:$0xff] %v780_v0  ;;  %62 = vst [vmem:[#allocation7 + $0x68] sm:$0xff] %v780_v0 }
  0x2e   :  { %63 = vst [vmem:[#allocation7 + $0x70] sm:$0xff] %v780_v0  ;;  %64 = vst [vmem:[#allocation7 + $0x78] sm:$0xff] %v780_v0 }
  0x2f LB: > { %s87_s6 = scalar_lea.vmem [#allocation2], %s774_s1  ;;  %v89_v18 = vld [vmem:[#allocation5] sm:$0xff]  ;;  %v90_v19 = vld [vmem:[#allocation5 + $0x8] sm:$0xff]  ;;  %v91_v20 = vld [vmem:[#allocation5 + $0x10] sm:$0xff]  ;;  %s70_s1 = sadd.s32 1, %s774_s1   ;;  %s774_s1 = sphi %s863_s1, %s70_s1   ;;  %v770_v16 = vphi %v861_v16, %v1023_v16   ;;  %v766_v15 = vphi %v859_v15, %v1022_v15   ;;  %v762_v14 = vphi %v857_v14, %v1021_v14   ;;  %v758_v13 = vphi %v855_v13, %v1020_v13   ;;  %v754_v12 = vphi %v853_v12, %v1019_v12   ;;  %v750_v11 = vphi %v851_v11, %v1018_v11   ;;  %v746_v10 = vphi %v849_v10, %v1017_v10   ;;  %v742_v9 = vphi %v847_v9, %v1016_v9   ;;  %v738_v8 = vphi %v845_v8, %v1015_v8   ;;  %v734_v7 = vphi %v843_v7, %v1014_v7   ;;  %v730_v6 = vphi %v841_v6, %v1013_v6   ;;  %v726_v5 = vphi %v839_v5, %v1012_v5   ;;  %v722_v4 = vphi %v837_v4, %v1011_v4   ;;  %v718_v3 = vphi %v835_v3, %v1010_v3   ;;  %v714_v2 = vphi %v833_v2, %v1009_v2   ;;  %v710_v1 = vphi %v831_v1, %v1008_v1  }
  0x30   : > { %v393_v17 = vld [vmem:[%s87_s6] ss:$0 sm:$0xff]  ;;  %v93_v22 = vld [vmem:[#allocation5 + $0x20] sm:$0xff]  ;;  %v94_v23 = vld [vmem:[#allocation5 + $0x28] sm:$0xff]  ;;  %p940_p2 = scmp.ge.s32.totalorder %s70_s1, 8  }
  0x31   : > { %v92_v21 = vld [vmem:[#allocation5 + $0x18] sm:$0xff]  ;;  %v109_v24 = vsub.f32 %v393_v17, %v89_v18  ;;  %v110_v25 = vsub.f32 %v393_v17, %v90_v19  ;;  %v95_v26 = vld [vmem:[#allocation5 + $0x30] sm:$0xff]  ;;  %v111_v27 = vsub.f32 %v393_v17, %v91_v20  ;;  %v113_v30 = vsub.f32 %v393_v17, %v93_v22  ;;  %v97_v31 = vld [vmem:[#allocation5 + $0x40] sm:$0xff]  ;;  %s781_s8 = smov (%p940_p2), [#allocation7]  }
  0x32   : > { %v112_v28 = vsub.f32 %v393_v17, %v92_v21  ;;  %v96_v29 = vld [vmem:[#allocation5 + $0x38] sm:$0xff]  ;;  %v114_v32 = vsub.f32 %v393_v17, %v94_v23  ;;  %v98_v33 = vld [vmem:[#allocation5 + $0x48] sm:$0xff]  ;;  %v115_v34 = vsub.f32 %v393_v17, %v95_v26  ;;  %v99_v37 = vld [vmem:[#allocation5 + $0x50] sm:$0xff]  ;;  %v117_v42 = vsub.f32 %v393_v17, %v97_v31  ;;  %s326_s9 = sshll.u32 (%p940_p2), %s781_s8, 4  ;;  %s327_s9 = int_to_ptr.vmem [resolvable:$true] %s326_s9 }
  0x33   : > { %v125_v35 = vand.u32 2147483647, %v109_v24  ;;  %v126_v36 = vand.u32 2147483647, %v110_v25  ;;  %v116_v38 = vsub.f32 %v393_v17, %v96_v29  ;;  %v127_v39 = vand.u32 2147483647, %v111_v27  ;;  %p617_p4 = scmp.lt.s32.totalorder (%p940_p2), %s327_s9, %s327_s9 }
  0x34   : > { %v128_v40 = vand.u32 2147483647, %v112_v28  ;;  %v100_v41 = vld [vmem:[#allocation5 + $0x58] sm:$0xff]  ;;  %v129_v43 = vand.u32 2147483647, %v113_v30  ;;  %v101_v44 = vld [vmem:[#allocation5 + $0x60] sm:$0xff]  ;;  %v118_v46 = vsub.f32 %v393_v17, %v98_v33  ;;  %v119_v50 = vsub.f32 %v393_v17, %v99_v37 }
  0x35   : > { %v102_v45 = vld [vmem:[#allocation5 + $0x68] sm:$0xff]  ;;  %v130_v47 = vand.u32 2147483647, %v114_v32  ;;  %v103_v48 = vld [vmem:[#allocation5 + $0x70] sm:$0xff]  ;;  %v104_v49 = vld [vmem:[#allocation5 + $0x78] sm:$0xff]  ;;  %v141_v52 = vsub.f32 1.0, %v125_v35  ;;  %v120_v54 = vsub.f32 %v393_v17, %v100_v41  ;;  %v121_v58 = vsub.f32 %v393_v17, %v101_v44 }
  0x36   : > { %v131_v51 = vand.u32 2147483647, %v115_v34  ;;  %v142_v53 = vsub.f32 1.0, %v126_v36  ;;  %v132_v55 = vand.u32 2147483647, %v116_v38  ;;  %v143_v56 = vsub.f32 1.0, %v127_v39 }
  0x37   : > { %v144_v57 = vsub.f32 1.0, %v128_v40  ;;  %v122_v59 = vsub.f32 %v393_v17, %v102_v45  ;;  %v133_v60 = vand.u32 2147483647, %v117_v42  ;;  %v145_v61 = vsub.f32 1.0, %v129_v43  ;;  %s612_s10 = scalar_lea.vmem (%p940_p2), %s327_s9, 2048 }
  0x38   : > { %v123_v62 = vsub.f32 %v393_v17, %v103_v48  ;;  %v124_v63 = vsub.f32 %v393_v17, %v104_v49  ;;  %v134_v0 = vand.u32 2147483647, %v118_v46  ;;  %v146_v18 = vsub.f32 1.0, %v130_v47  ;;  %p613_p3 = scmp.ne.s32.totalorder (%p940_p2), %s327_s9, %s612_s10  ;;  %p618_p5 = scmp.lt.s32.totalorder (%p940_p2), %s612_s10, %s612_s10 }
  0x39   : > { %v135_v19 = vand.u32 2147483647, %v119_v50  ;;  %v147_v20 = vsub.f32 1.0, %v131_v51  ;;  %v157_v21 = vmin.f32 %v125_v35, %v141_v52  ;;  %v158_v22 = vmin.f32 %v126_v36, %v142_v53 }
  0x3a   : > { %v136_v23 = vand.u32 2147483647, %v120_v54  ;;  %v148_v24 = vsub.f32 1.0, %v132_v55  ;;  %v159_v25 = vmin.f32 %v127_v39, %v143_v56  ;;  %v160_v26 = vmin.f32 %v128_v40, %v144_v57  ;;  %p619_p6 = por (%p940_p2), %p618_p5, %p617_p4 }
  0x3b   : > { %v137_v27 = vand.u32 2147483647, %v121_v58  ;;  %v138_v28 = vand.u32 2147483647, %v122_v59  ;;  %v149_v29 = vsub.f32 1.0, %v133_v60  ;;  %v161_v30 = vmin.f32 %v129_v43, %v145_v61 }
  0x3c   : > { %v139_v31 = vand.u32 2147483647, %v123_v62  ;;  %v140_v32 = vand.u32 2147483647, %v124_v63  ;;  %v150_v33 = vsub.f32 1.0, %v134_v0  ;;  %v162_v34 = vmin.f32 %v130_v47, %v146_v18  ;;  %p620_p7 = pnand (%p940_p2), %p619_p6, %p613_p3 }
  0x3d   : > { %v151_v37 = vsub.f32 1.0, %v135_v19  ;;  %v163_v17 = vmin.f32 %v131_v51, %v147_v20  ;;  %v173_v38 = vadd.f32 1e-07, %v157_v21  ;;  %v174_v41 = vadd.f32 1e-07, %v158_v22 }
  0x3e   : > { %v152_v42 = vsub.f32 1.0, %v136_v23  ;;  %v164_v44 = vmin.f32 %v132_v55, %v148_v24  ;;  %v175_v35 = vadd.f32 1e-07, %v159_v25  ;;  %v176_v36 = vadd.f32 1e-07, %v160_v26 }
  0x3f   : > { %v153_v45 = vsub.f32 1.0, %v137_v27  ;;  %v154_v46 = vsub.f32 1.0, %v138_v28  ;;  %v165_v39 = vmin.f32 %v133_v60, %v149_v29  ;;  %v177_v40 = vadd.f32 1e-07, %v161_v30 }
  0x40   : > { %v155_v48 = vsub.f32 1.0, %v139_v31  ;;  %v156_v49 = vsub.f32 1.0, %v140_v32  ;;  %v166_v50 = vmin.f32 %v134_v0, %v150_v33  ;;  %v178_v43 = vadd.f32 1e-07, %v162_v34 }
  0x41   : > { %v167_v52 = vmin.f32 %v135_v19, %v151_v37  ;;  %v179_v53 = vadd.f32 1e-07, %v163_v17  ;;  %v189_v54 = vmul.f32 %v173_v38, %v173_v38  ;;  %v190_v47 = vmul.f32 %v174_v41, %v174_v41 }
  0x42   : > { %v168_v56 = vmin.f32 %v136_v23, %v152_v42  ;;  %v180_v51 = vadd.f32 1e-07, %v164_v44  ;;  %v191_v57 = vmul.f32 %v175_v35, %v175_v35  ;;  %v192_v58 = vmul.f32 %v176_v36, %v176_v36 }
  0x43   : > { %v169_v59 = vmin.f32 %v137_v27, %v153_v45  ;;  %v170_v55 = vmin.f32 %v138_v28, %v154_v46  ;;  %v181_v61 = vadd.f32 1e-07, %v165_v39  ;;  %v193_v62 = vmul.f32 %v177_v40, %v177_v40 }
  0x44   : > { %v171_v63 = vmin.f32 %v139_v31, %v155_v48  ;;  %v172_v18 = vmin.f32 %v140_v32, %v156_v49  ;;  %v182_v60 = vadd.f32 1e-07, %v166_v50  ;;  %v194_v20 = vmul.f32 %v178_v43, %v178_v43 }
  0x45   : > { %v183_v21 = vadd.f32 1e-07, %v167_v52  ;;  %v195_v22 = vmul.f32 %v179_v53, %v179_v53  ;;  %v205_v0 = vmul.f32 -20.0, %v189_v54  ;;  %v206_v24 = vmul.f32 -20.0, %v190_v47 }
  0x46   : > { %v184_v19 = vadd.f32 1e-07, %v168_v56  ;;  %v196_v25 = vmul.f32 %v180_v51, %v180_v51  ;;  %v207_v26 = vmul.f32 -20.0, %v191_v57  ;;  %v208_v29 = vmul.f32 -20.0, %v192_v58 }
  0x47   : > { %v185_v23 = vadd.f32 1e-07, %v169_v59  ;;  %v186_v30 = vadd.f32 1e-07, %v170_v55  ;;  %v197_v33 = vmul.f32 %v181_v61, %v181_v61  ;;  %v209_v34 = vmul.f32 -20.0, %v193_v62 }
  0x48   : > { %v187_v27 = vadd.f32 1e-07, %v171_v63  ;;  %v188_v28 = vadd.f32 1e-07, %v172_v18  ;;  %v198_v37 = vmul.f32 %v182_v60, %v182_v60  ;;  %v210_v17 = vmul.f32 -20.0, %v194_v20 }
  0x49   : > { %v199_v31 = vmul.f32 %v183_v21, %v183_v21  ;;  %v211_v32 = vmul.f32 -20.0, %v195_v22  ;;  %v221_v38 = vmul.f32 1.442695, %v205_v0  ;;  %v223_v41 = vmul.f32 1.442695, %v206_v24 }
  0x4a   : > { %v200_v42 = vmul.f32 %v184_v19, %v184_v19  ;;  %v212_v44 = vmul.f32 -20.0, %v196_v25  ;;  %v225_v35 = vmul.f32 1.442695, %v207_v26  ;;  %v227_v36 = vmul.f32 1.442695, %v208_v29 }
  0x4b   : > { %v201_v45 = vmul.f32 %v185_v23, %v185_v23  ;;  %v213_v46 = vmul.f32 -20.0, %v197_v33  ;;  %536 = vpow2.f32 %v221_v38  ;;  %v229_v39 = vmul.f32 1.442695, %v209_v34 }
  0x4c   : > { %v202_v40 = vmul.f32 %v186_v30, %v186_v30  ;;  %v214_v48 = vmul.f32 -20.0, %v198_v37  ;;  %538 = vpow2.f32 %v223_v41  ;;  %v231_v49 = vmul.f32 1.442695, %v210_v17 }
  0x4d   : > { %v203_v50 = vmul.f32 %v187_v27, %v187_v27  ;;  %v215_v43 = vmul.f32 -20.0, %v199_v31  ;;  %540 = vpow2.f32 %v225_v35  ;;  %v233_v52 = vmul.f32 1.442695, %v211_v32 }
  0x4e   : > { %v204_v53 = vmul.f32 %v188_v28, %v188_v28  ;;  %v216_v54 = vmul.f32 -20.0, %v200_v42  ;;  %542 = vpow2.f32 %v227_v36  ;;  %v235_v47 = vmul.f32 1.442695, %v212_v44 }
  0x4f   : > { %v217_v56 = vmul.f32 -20.0, %v201_v45  ;;  %544 = vpow2.f32 %v229_v39  ;;  %v237_v51 = vmul.f32 1.442695, %v213_v46  ;;  %v218_v57 = vmul.f32 -20.0, %v202_v40  ;;  %v269_v46 = vld [vmem:[#allocation7] sm:$0xff] (%p940_p2)  ;;  %v270_v39 = vld [vmem:[#allocation7 + $0x8] sm:$0xff] (%p940_p2) }
  0x50   : > { %546 = vpow2.f32 %v231_v49  ;;  %v239_v58 = vmul.f32 1.442695, %v214_v48  ;;  %v219_v59 = vmul.f32 -20.0, %v203_v50  ;;  %v241_v55 = vmul.f32 1.442695, %v215_v43  ;;  %v271_v40 = vld [vmem:[#allocation7 + $0x10] sm:$0xff] (%p940_p2) }
  0x51   : > { %548 = vpow2.f32 %v233_v52  ;;  %v220_v61 = vmul.f32 -20.0, %v204_v53  ;;  %v243_v62 = vmul.f32 1.442695, %v216_v54  ;;  %v245_v63 = vmul.f32 1.442695, %v217_v56  ;;  %v272_v43 = vld [vmem:[#allocation7 + $0x18] sm:$0xff] (%p940_p2) }
  0x52   : > { %550 = vpow2.f32 %v235_v47  ;;  %v247_v18 = vmul.f32 1.442695, %v218_v57  ;;  %v249_v20 = vmul.f32 1.442695, %v219_v59  ;;  %v273_v52 = vld [vmem:[#allocation7 + $0x20] sm:$0xff] (%p940_p2)  ;;  %v274_v53 = vld [vmem:[#allocation7 + $0x28] sm:$0xff] (%p940_p2) }
  0x53   : > { %552 = vpow2.f32 %v237_v51  ;;  %v251_v22 = vmul.f32 1.442695, %v220_v61  ;;  %v275_v51 = vld [vmem:[#allocation7 + $0x30] sm:$0xff] (%p940_p2)  ;;  %v276_v57 = vld [vmem:[#allocation7 + $0x38] sm:$0xff] (%p940_p2) }
  0x54   : > { %554 = vpow2.f32 %v239_v58  ;;  %v277_v58 = vld [vmem:[#allocation7 + $0x40] sm:$0xff] (%p940_p2)  ;;  %v283_v61 = vld [vmem:[#allocation7 + $0x70] sm:$0xff] (%p940_p2) }
  0x55   : > { %v537_v60 = vpop.eup %536  ;;  %556 = vpow2.f32 %v241_v55 }
  0x56   : > { %v539_v21 = vpop.eup %538  ;;  %558 = vpow2.f32 %v243_v62  ;;  %v253_v0 = vadd.f32 %v770_v16, %v537_v60   ;;  %v284_v60 = vld [vmem:[#allocation7 + $0x78] sm:$0xff] (%p940_p2) }
  0x57   : > { %v541_v24 = vpop.eup %540  ;;  %560 = vpow2.f32 %v245_v63  ;;  %v254_v19 = vadd.f32 %v766_v15, %v539_v21  }
  0x58   : > { %v543_v25 = vpop.eup %542  ;;  %562 = vpow2.f32 %v247_v18  ;;  %v255_v26 = vadd.f32 %v762_v14, %v541_v24   ;;  %v285_v48 = vadd.f32 (%p940_p2), %v269_v46, %v253_v0 }
  0x59   : > { %v545_v29 = vpop.eup %544  ;;  %564 = vpow2.f32 %v249_v20  ;;  %v256_v23 = vadd.f32 %v758_v13, %v543_v25   ;;  %v286_v49 = vadd.f32 (%p940_p2), %v270_v39, %v254_v19 }
  0x5a   : > { %v547_v30 = vpop.eup %546  ;;  %566 = vpow2.f32 %v251_v22  ;;  %v257_v33 = vadd.f32 %v754_v12, %v545_v29   ;;  %v287_v50 = vadd.f32 (%p940_p2), %v271_v40, %v255_v26  ;;  %301 = vst [vmem:[#allocation7] sm:$0xff] (%p940_p2), %v285_v48 }
  0x5b   : > { %v549_v34 = vpop.eup %548  ;;  %v258_v27 = vadd.f32 %v750_v11, %v547_v30   ;;  %v288_v54 = vadd.f32 (%p940_p2), %v272_v43, %v256_v23  ;;  %302 = vst [vmem:[#allocation7 + $0x8] sm:$0xff] (%p940_p2), %v286_v49 }
  0x5c   : > { %v551_v16 = vpop.eup %550  ;;  %v259_v28 = vadd.f32 %v746_v10, %v549_v34   ;;  %v289_v47 = vadd.f32 (%p940_p2), %v273_v52, %v257_v33  ;;  %303 = vst [vmem:[#allocation7 + $0x10] sm:$0xff] (%p940_p2), %v287_v50 }
  0x5d   : > { %v553_v37 = vpop.eup %552  ;;  %v260_v17 = vadd.f32 %v742_v9, %v551_v16   ;;  %v1018_v11 = vmov %v258_v27  ;;  %v1023_v16 = vmov %v253_v0  ;;  %v290_v56 = vadd.f32 (%p940_p2), %v274_v53, %v258_v27  ;;  %304 = vst [vmem:[#allocation7 + $0x18] sm:$0xff] (%p940_p2), %v288_v54 }
  0x5e   : > { %v555_v15 = vpop.eup %554  ;;  %v261_v31 = vadd.f32 %v738_v8, %v553_v37   ;;  %v291_v59 = vadd.f32 (%p940_p2), %v275_v51, %v259_v28  ;;  %305 = vst [vmem:[#allocation7 + $0x20] sm:$0xff] (%p940_p2), %v289_v47  ;;  %v282_v11 = vld [vmem:[#allocation7 + $0x68] sm:$0xff] (%p940_p2) }
  0x5f   : > { %v557_v14 = vpop.eup %556  ;;  %v262_v32 = vadd.f32 %v734_v7, %v555_v15   ;;  %v1022_v15 = vmov %v254_v19  ;;  %v292_v55 = vadd.f32 (%p940_p2), %v276_v57, %v260_v17  ;;  %306 = vst [vmem:[#allocation7 + $0x28] sm:$0xff] (%p940_p2), %v290_v56 }
  0x60   : > { %v559_v13 = vpop.eup %558  ;;  %v263_v38 = vadd.f32 %v730_v6, %v557_v14   ;;  %v1015_v8 = vmov %v261_v31  ;;  %v1021_v14 = vmov %v255_v26  ;;  %307 = vst [vmem:[#allocation7 + $0x30] sm:$0xff] (%p940_p2), %v291_v59 }
  0x61   : > { %v561_v41 = vpop.eup %560  ;;  %v264_v42 = vadd.f32 %v726_v5, %v559_v13   ;;  %v1014_v7 = vmov %v262_v32  ;;  %v1020_v13 = vmov %v256_v23  ;;  %v281_v8 = vld [vmem:[#allocation7 + $0x60] sm:$0xff] (%p940_p2)  ;;  %308 = vst [vmem:[#allocation7 + $0x38] sm:$0xff] (%p940_p2), %v292_v55 }
  0x62   : > { %v563_v12 = vpop.eup %562  ;;  %v930_v4 = vadd.f32 %v722_v4, %v561_v41   ;;  %v1013_v6 = vmov %v263_v38  ;;  %69 = sbr.rel (!%p940_p2) target bundleno = 47 (0x2f), region = 50 }
  0x63   : > { %v565_v10 = vpop.eup %564  ;;  %v933_v3 = vadd.f32 %v718_v3, %v563_v12   ;;  %v1012_v5 = vmov %v264_v42  ;;  %v1019_v12 = vmov %v257_v33 }
  0x64   : > { %v1004_v44 = vmov %v930_v4  ;;  %v567_v9 = vpop.eup %566  ;;  %v267_v36 = vadd.f32 %v714_v2, %v565_v10   ;;  %v1017_v10 = vmov %v259_v28 }
  0x65   : > { %v1005_v35 = vmov %v933_v3  ;;  %v937_v1 = vadd.f32 %v710_v1, %v567_v9   ;;  %v1011_v4 = vmov %v1004_v44  ;;  %v1016_v9 = vmov %v260_v17 }
  0x66   : > { %v1009_v2 = vmov %v267_v36  ;;  %v1010_v3 = vmov %v1005_v35  ;;  %v280_v4 = vld [vmem:[#allocation7 + $0x58] sm:$0xff] (%p940_p2)  ;;  %v297_v62 = vadd.f32 (%p940_p2), %v281_v8, %v1004_v44  ;;  %v298_v63 = vadd.f32 (%p940_p2), %v282_v11, %v1005_v35 }
  0x67   : > { %v1006_v45 = vmov %v937_v1  ;;  %v278_v2 = vld [vmem:[#allocation7 + $0x48] sm:$0xff] (%p940_p2)  ;;  %v279_v3 = vld [vmem:[#allocation7 + $0x50] sm:$0xff] (%p940_p2)  ;;  %v296_v7 = vadd.f32 (%p940_p2), %v280_v4, %v264_v42  ;;  %v299_v18 = vadd.f32 (%p940_p2), %v283_v61, %v267_v36 }
  0x68   : > { %v1008_v1 = vmov %v1006_v45  ;;  %v294_v5 = vadd.f32 (%p940_p2), %v278_v2, %v262_v32  ;;  %v295_v6 = vadd.f32 (%p940_p2), %v279_v3, %v263_v38  ;;  %v300_v20 = vadd.f32 (%p940_p2), %v284_v60, %v1006_v45  ;;  %313 = vst [vmem:[#allocation7 + $0x60] sm:$0xff] (%p940_p2), %v297_v62  ;;  %314 = vst [vmem:[#allocation7 + $0x68] sm:$0xff] (%p940_p2), %v298_v63 }
  0x69   :  { %v293_v1 = vadd.f32 %v277_v58, %v261_v31  ;;  %312 = vst [vmem:[#allocation7 + $0x58] sm:$0xff] %v296_v7  ;;  %315 = vst [vmem:[#allocation7 + $0x70] sm:$0xff] %v299_v18 }
  0x6a   :  { %310 = vst [vmem:[#allocation7 + $0x48] sm:$0xff] %v294_v5  ;;  %311 = vst [vmem:[#allocation7 + $0x50] sm:$0xff] %v295_v6 }
  0x6b   :  { %309 = vst [vmem:[#allocation7 + $0x40] sm:$0xff] %v293_v1  ;;  %316 = vst [vmem:[#allocation7 + $0x78] sm:$0xff] %v300_v20 }
  0x6c   :  { %623 = shalt.err (!%p620_p7)
}
  0x6d   :  { %s624_s13 = scalar_lea.hbm %s1003_s2, 2048 }
  0x6e   :  { %p625_p8 = scmp.ne.s32.totalorder %s1003_s2, %s624_s13  ;;  %p628_p9 = scmp.lt.u32.totalorder %s624_s13, %s1003_s2 }
  0x70   :  { %p630_p10 = pnand %p628_p9, %p625_p8 }
  0x72   :  { %633 = shalt.err (!%p630_p10)
}
  0x73   :  { %332 = dma.vmem_to_hbm [thread:$0]  %s327_s9, 2048, %s1003_s2, [#allocation4], %s778_s0, %s778_s0, %s779_s3  }
  0x74   :  { %706 = dma.done.wait [#allocation4], 2048  }
  0x75   :  { %707 = vsyncadd [#allocation4], 4294965248 }
  0x76   :  { %336 = vsyncpa [#allocation3], 1 }
  0x77   :  { %337 = vsyncpa [#allocation6], 1 }
  0x78   :  { %338 = vsyncpa [#allocation4], 1 }

</bundles_post_ra>
